<compile_context>
chip_gen: v6e
topology: v6e:2x2x1
jax: 0.10.0
libtpu: 0.0.40
codegen_flags: <defaults>
</compile_context>

<pallas_src>
import functools

import jax
import jax.numpy as jnp
from jax import lax
from jax.experimental import pallas as pl
from jax.experimental.pallas import tpu as pltpu


def _mapping_head_kernel(x_ref, w_ref, b_ref, o_ref, acc_ref):
    # x_ref  : [TM, TK]   rows tile of flattened input
    # w_ref  : [TN, TK]   weight tile (PyTorch [out, in] layout; contract on in)
    # b_ref  : [1, TN]    bias tile
    # o_ref  : [TM, TN]   output tile
    # acc_ref: [TM, TN]   f32 accumulator, persists across the K grid axis
    k = pl.program_id(2)

    @pl.when(k == 0)
    def _():
        acc_ref[...] = jnp.zeros_like(acc_ref)

    # Transpose-free contraction: x's last dim against weight's last dim (MXU).
    acc_ref[...] += lax.dot_general(
        x_ref[...], w_ref[...],
        dimension_numbers=(((1,), (1,)), ((), ())),
        preferred_element_type=jnp.float32,
    )

    @pl.when(k == pl.num_programs(2) - 1)
    def _():
        acc = acc_ref[...] + b_ref[...].astype(jnp.float32)
        o_ref[...] = jnp.maximum(acc, 0.0).astype(o_ref.dtype)


def _round_up(x, m):
    return (x + m - 1) // m * m


def _pick_hidden_tile(dim, max_tile=512):
    """Largest multiple-of-128 divisor of `dim` that is <= max_tile, else full dim."""
    if dim <= max_tile or dim % 128 != 0:
        return dim
    t = max_tile - (max_tile % 128)
    while t >= 128:
        if dim % t == 0:
            return t
        t -= 128
    return dim


@functools.partial(jax.jit, static_argnames=("tile_m",))
def mapping_head(x, weight, bias, *, tile_m=None):
    """y = relu(x @ weight.T + bias); x: [..., H_in], weight: [H_out, H_in]."""
    orig_shape = x.shape
    H_out, H_in = weight.shape
    x2d = x.reshape(-1, H_in)
    M = x2d.shape[0]

    # Bounded default row tile: large enough to approach the HBM roofline,
    # small enough (together with N/K tiles) to stay well under v7x's 64 MiB
    # VMEM. Clamp to (sublane-rounded) M when M is small.
    if tile_m is None:
        default_tm = 1024 if x.dtype == jnp.bfloat16 else 512
        tile_m = min(default_tm, _round_up(M, 8))
    tile_m = _round_up(int(tile_m), 8)

    # Pad rows so every grid step sees a full, sublane-aligned tile.
    M_pad = _round_up(M, tile_m)
    if M_pad != M:
        x2d = jnp.pad(x2d, ((0, M_pad - M), (0, 0)))

    # N/K tiles: lane-aligned (multiples of 128) when H allows; otherwise the
    # full extent (e.g. H=32), which is still a valid Mosaic block shape.
    # TODO(synk): for H < 128 the masked-lane stores make this launch-overhead
    # dominated; a plain fused XLA op would match it at those shapes.
    tile_n = _pick_hidden_tile(H_out)
    tile_k = _pick_hidden_tile(H_in)

    b2d = bias.reshape(1, H_out)

    grid = (M_pad // tile_m, H_out // tile_n, H_in // tile_k)

    itemsize = jnp.dtype(x.dtype).itemsize
    # Per-step VMEM: double-buffered x/w/b/out tiles + the f32 accumulator.
    vmem_est = (
        2 * (tile_m * tile_k + tile_n * tile_k + tile_n + tile_m * tile_n) * itemsize
        + tile_m * tile_n * 4
    )
    # Explicit scoped-VMEM limit: above the 32 MiB default when needed, capped
    # at 64 MiB so the same config also fits v7x's smaller physical VMEM.
    vmem_limit = int(min(64 * 1024 * 1024, max(32 * 1024 * 1024, 2 * vmem_est)))

    cost = pl.CostEstimate(
        flops=2 * M_pad * H_in * H_out,
        transcendentals=0,
        bytes_accessed=(M_pad * H_in + H_out * H_in + H_out + M_pad * H_out) * itemsize,
    )

    out = pl.pallas_call(
        _mapping_head_kernel,
        out_shape=jax.ShapeDtypeStruct((M_pad, H_out), x.dtype),
        grid_spec=pltpu.PrefetchScalarGridSpec(
            num_scalar_prefetch=0,
            grid=grid,
            in_specs=[
                pl.BlockSpec((tile_m, tile_k), lambda i, j, k: (i, k)),   # x rows/K tile
                pl.BlockSpec((tile_n, tile_k), lambda i, j, k: (j, k)),   # weight N/K tile
                pl.BlockSpec((1, tile_n), lambda i, j, k: (0, j)),        # bias N tile
            ],
            out_specs=pl.BlockSpec((tile_m, tile_n), lambda i, j, k: (i, j)),
            scratch_shapes=[pltpu.VMEM((tile_m, tile_n), jnp.float32)],
        ),
        compiler_params=pltpu.CompilerParams(
            dimension_semantics=("parallel", "parallel", "arbitrary"),
            vmem_limit_bytes=vmem_limit,
        ),
        cost_estimate=cost,
    )(x2d, weight, b2d)

    if M_pad != M:
        out = out[:M]
    return out.reshape(orig_shape[:-1] + (H_out,))


if __name__ == "__main__":
    # Small shapes: batch=2, seq=8, code_hidden_size=32
    B, S, H = 2, 8, 32
    key = jax.random.PRNGKey(0)
    kx, kw, kb = jax.random.split(key, 3)

    x = jax.random.normal(kx, (B, S, H), dtype=jnp.float32)
    # Deterministic Linear params (nn.Linear(H, H): weight [H_out, H_in], bias [H_out])
    bound = 1.0 / (H ** 0.5)
    weight = jax.random.uniform(kw, (H, H), minval=-bound, maxval=bound,
                                dtype=jnp.float32)
    bias = jax.random.uniform(kb, (H,), minval=-bound, maxval=bound,
                              dtype=jnp.float32)

    y = mapping_head(x, weight, bias)
    jax.block_until_ready(y)

    # Reference check against plain JAX
    y_ref = jnp.maximum(jnp.einsum("bsh,oh->bso", x, weight) + bias, 0.0)
    assert y.shape == (B, S, H)
    assert jnp.allclose(y, y_ref, atol=1e-5, rtol=1e-5)

    print("KERNEL_OK")
</pallas_src>

<mosaic_0001>
module attributes {stable_mosaic.version = 11 : i64} {
  func.func @_mapping_head_kernel(%arg0: i32, %arg1: i32, %arg2: i32, %arg3: memref<16x32xf32, #tpu.memory_space<vmem>>, %arg4: memref<32x32xf32, #tpu.memory_space<vmem>>, %arg5: memref<1x32xf32, #tpu.memory_space<vmem>>, %arg6: memref<16x32xf32, #tpu.memory_space<vmem>>, %arg7: memref<16x32xf32, #tpu.memory_space<vmem>>) attributes {dimension_semantics = [#tpu.dimension_semantics<parallel>, #tpu.dimension_semantics<parallel>, #tpu.dimension_semantics<arbitrary>], iteration_bounds = array<i64: 1, 1, 1>, scalar_prefetch = 0 : i64, scratch_operands = 1 : i64, tpu.core_type = #tpu.core_type<tc>, window_params = [{transform_indices = @transform_0, window_bounds = array<i64: 16, 32>}, {transform_indices = @transform_1, window_bounds = array<i64: 32, 32>}, {transform_indices = @transform_2, window_bounds = array<i64: 1, 32>}, {transform_indices = @transform_3, window_bounds = array<i64: 16, 32>}]} {
    %c0_i32 = arith.constant 0 : i32
    %0 = arith.cmpi eq, %arg2, %c0_i32 : i32
    %1 = arith.extui %0 : i1 to i32
    %c0_i32_0 = arith.constant 0 : i32
    %2 = arith.cmpi ne, %1, %c0_i32_0 : i32
    scf.if %2 {
      %cst_10 = arith.constant 0.000000e+00 : f32
      %12 = vector.broadcast %cst_10 : f32 to vector<16x32xf32>
      %c0_11 = arith.constant 0 : index
      %c0_12 = arith.constant 0 : index
      %13 = vector.load %arg7[%c0_11, %c0_12] : memref<16x32xf32, #tpu.memory_space<vmem>>, vector<16x32xf32>
      tpu.vector_store %arg7[%c0_11, %c0_12], %12 {strides = array<i32>} : memref<16x32xf32, #tpu.memory_space<vmem>>, vector<16x32xf32>,
    } else {
    }
    %c0 = arith.constant 0 : index
    %c0_1 = arith.constant 0 : index
    %3 = vector.load %arg7[%c0, %c0_1] : memref<16x32xf32, #tpu.memory_space<vmem>>, vector<16x32xf32>
    %c0_2 = arith.constant 0 : index
    %c0_3 = arith.constant 0 : index
    %4 = vector.load %arg3[%c0_2, %c0_3] : memref<16x32xf32, #tpu.memory_space<vmem>>, vector<16x32xf32>
    %c0_4 = arith.constant 0 : index
    %c0_5 = arith.constant 0 : index
    %5 = vector.load %arg4[%c0_4, %c0_5] : memref<32x32xf32, #tpu.memory_space<vmem>>, vector<32x32xf32>
    %cst = arith.constant dense<0.000000e+00> : vector<16x32xf32>
    %6 = tpu.matmul %4, %5, %cst {dimension_numbers = #tpu.dot_dimension_numbers<[1], [1], [0], [0], [0, 0, 1, 0], [], []>} : vector<16x32xf32>, vector<32x32xf32>, vector<16x32xf32> -> vector<16x32xf32>
    %7 = arith.addf %3, %6 : vector<16x32xf32>
    %c0_6 = arith.constant 0 : index
    %c0_7 = arith.constant 0 : index
    %8 = vector.load %arg7[%c0_6, %c0_7] : memref<16x32xf32, #tpu.memory_space<vmem>>, vector<16x32xf32>
    tpu.vector_store %arg7[%c0_6, %c0_7], %7 {strides = array<i32>} : memref<16x32xf32, #tpu.memory_space<vmem>>, vector<16x32xf32>,
    %c0_i32_8 = arith.constant 0 : i32
    %9 = arith.cmpi eq, %arg2, %c0_i32_8 : i32
    %10 = arith.extui %9 : i1 to i32
    %c0_i32_9 = arith.constant 0 : i32
    %11 = arith.cmpi ne, %10, %c0_i32_9 : i32
    scf.if %11 {
      %c0_10 = arith.constant 0 : index
      %c0_11 = arith.constant 0 : index
      %12 = vector.load %arg7[%c0_10, %c0_11] : memref<16x32xf32, #tpu.memory_space<vmem>>, vector<16x32xf32>
      %c0_12 = arith.constant 0 : index
      %c0_13 = arith.constant 0 : index
      %13 = vector.load %arg5[%c0_12, %c0_13] : memref<1x32xf32, #tpu.memory_space<vmem>>, vector<1x32xf32>
      %14 = vector.broadcast %13 : vector<1x32xf32> to vector<16x32xf32>
      %15 = arith.addf %12, %14 : vector<16x32xf32>
      %cst_14 = arith.constant 0.000000e+00 : f32
      %16 = vector.broadcast %cst_14 : f32 to vector<16x32xf32>
      %17 = arith.maximumf %15, %16 : vector<16x32xf32>
      %c0_15 = arith.constant 0 : index
      %c0_16 = arith.constant 0 : index
      %18 = vector.load %arg6[%c0_15, %c0_16] : memref<16x32xf32, #tpu.memory_space<vmem>>, vector<16x32xf32>
      tpu.vector_store %arg6[%c0_15, %c0_16], %17 {strides = array<i32>} : memref<16x32xf32, #tpu.memory_space<vmem>>, vector<16x32xf32>,
    } else {
    }
    return
  }
  func.func @transform_0(%arg0: i32, %arg1: i32, %arg2: i32) -> (i32, i32) {
    %c0_i32 = arith.constant 0 : i32
    return %arg0, %arg2 : i32, i32
  }
  func.func @transform_1(%arg0: i32, %arg1: i32, %arg2: i32) -> (i32, i32) {
    %c0_i32 = arith.constant 0 : i32
    return %arg1, %arg2 : i32, i32
  }
  func.func @transform_2(%arg0: i32, %arg1: i32, %arg2: i32) -> (i32, i32) {
    %c0_i32 = arith.constant 0 : i32
    %c0_i32_0 = arith.constant 0 : i32
    return %c0_i32, %arg1 : i32, i32
  }
  func.func @transform_3(%arg0: i32, %arg1: i32, %arg2: i32) -> (i32, i32) {
    %c0_i32 = arith.constant 0 : i32
    return %arg0, %arg1 : i32, i32
  }
}

</mosaic_0001>

<bundles_post_ra>
// kernel: mapping_head.1
= control target key start
LH: loop header
LB: loop body
LE: loop exit
PB: predicated region body
PF: predicated region fallthrough
CT: control target
= control target key end

     0   :  { %8 = vsyncpa [#allocation4], 0  ;;  %s351_s0 = inlined_call_operand.hbm [shape: f32[16,32], index: 0, kind: input, shape index: {}]   ;;  %s352_s1 = inlined_call_operand.hbm [shape: f32[32,32], index: 1, kind: input, shape index: {}]   ;;  %s353_s2 = inlined_call_operand.vmem [shape: f32[1,32], index: 2, kind: input, shape index: {}]   ;;  %s354_s3 = inlined_call_operand.hbm [shape: f32[16,32], index: 3, kind: output, shape index: {}]  }
   0x1   :  { %9 = vsyncpa [#allocation7], 0 }
   0x2   :  { %10 = vsyncpa [#allocation5], 0  ;;  %s288_s12 = smov [#allocation3]  }
   0x3   :  { %s16_s13 = sshll.u32 %s288_s12, 4  ;;  %s17_s13 = int_to_ptr.vmem [resolvable:$true] %s16_s13 }
   0x4   :  { %s230_s14 = scalar_lea.vmem %s17_s13, 256  ;;  %p235_p1 = scmp.lt.s32.totalorder %s17_s13, %s17_s13 }
   0x5   :  { %p231_p0 = scmp.ne.s32.totalorder %s17_s13, %s230_s14  ;;  %p236_p2 = scmp.lt.s32.totalorder %s230_s14, %s230_s14 }
   0x7   :  { %p237_p3 = por %p236_p2, %p235_p1 }
   0x9   :  { %p238_p4 = pnand %p237_p3, %p231_p0 }
   0xb   :  { %241 = shalt.err (!%p238_p4)
}
   0xc   :  { %s289_s15 = smov 128   ;;  %s290_s16 = smov 8  }
   0xd   :  { %22 = dma.hbm_to_vmem [thread:$0]  %s351_s0, 256, %s17_s13, [#allocation4], %s289_s15, %s289_s15, %s290_s16  }
   0xe   :  { %s291_s19 = smov [#allocation6]  }
   0xf   :  { %s28_s20 = sshll.u32 %s291_s19, 4  ;;  %s29_s20 = int_to_ptr.vmem [resolvable:$true] %s28_s20 }
  0x10   :  { %s250_s21 = scalar_lea.vmem %s29_s20, 512  ;;  %p255_p6 = scmp.lt.s32.totalorder %s29_s20, %s29_s20 }
  0x11   :  { %p251_p5 = scmp.ne.s32.totalorder %s29_s20, %s250_s21  ;;  %p256_p7 = scmp.lt.s32.totalorder %s250_s21, %s250_s21 }
  0x13   :  { %p257_p8 = por %p256_p7, %p255_p6 }
  0x15   :  { %p258_p9 = pnand %p257_p8, %p251_p5 }
  0x17   :  { %261 = shalt.err (!%p258_p9)
}
  0x18   :  { %34 = dma.hbm_to_vmem [thread:$0]  %s352_s1, 512, %s29_s20, [#allocation7], %s289_s15, %s289_s15, %s290_s16  }
  0x19   :  { %282 = dma.done.wait [#allocation4], 256  }
  0x1a   :  { %283 = vsyncadd [#allocation4], 4294967040 }
  0x1b   :  { %284 = dma.done.wait [#allocation7], 512  }
  0x1c   :  { %285 = vsyncadd [#allocation7], 4294966784  ;;  %vm47_vm0 = vcmask 261120   ;;  %v292_v0 = vmov 0.0   ;;  %v57_v1 = vld [vmem:[#allocation6 + $0x18] sm:$0xff]  ;;  %v56_v2 = vld [vmem:[#allocation6 + $0x10] sm:$0xff] }
  0x1d   :  { %49 = vst.msk [vmem:[#allocation2 + $0x8] sm:$0xff] %vm47_vm0, %v292_v0  ;;  %48 = vst.msk [vmem:[#allocation2] sm:$0xff] %vm47_vm0, %v292_v0  ;;  %205 = vmatprep.subr.msk.mxu0 %vm47_vm0, %v57_v1  ;;  %v52_v3 = vld [vmem:[#allocation3] sm:$0xff]  ;;  %v55_v4 = vld [vmem:[#allocation6 + $0x8] sm:$0xff]  ;;  %s293_s24 = smov [#allocation8]  }
  0x1e   :  { %206 = vmatpush3.xpose.msk.msra.mxu0 %vm47_vm0, %v57_v1  ;;  %213 = vmatprep.mubr.msk.f32.mxu0 %vm47_vm0, %v52_v3  ;;  %v54_v5 = vld [vmem:[#allocation6] sm:$0xff]  ;;  %v53_v6 = vld [vmem:[#allocation3 + $0x8] sm:$0xff]  ;;  %s179_s25 = sshll.u32 %s293_s24, 4  ;;  %s180_s25 = int_to_ptr.vmem [resolvable:$true] %s179_s25 }
  0x1f   :  { %207 = vmatprep.subr.msk.mxu0 %vm47_vm0, %v56_v2  ;;  %v198_v13 = vld [vmem:[%s353_s2] ss:$0 sm:$0xff]  ;;  %s262_s26 = scalar_lea.vmem %s180_s25, 256  ;;  %p267_p11 = scmp.lt.s32.totalorder %s180_s25, %s180_s25 }
  0x20   :  { %p263_p10 = scmp.ne.s32.totalorder %s180_s25, %s262_s26  ;;  %p268_p12 = scmp.lt.s32.totalorder %s262_s26, %s262_s26 }
  0x22   :  { %208 = vmatpush3.xpose.msk.msra.mxu0 %vm47_vm0, %v56_v2  ;;  %p269_p13 = por %p268_p12, %p267_p11 }
  0x23   :  { %209 = vmatprep.subr.msk.mxu0 %vm47_vm0, %v55_v4 }
  0x24   :  { %v51_v7 = vld [vmem:[#allocation2 + $0x8] sm:$0xff]  ;;  %v50_v9 = vld [vmem:[#allocation2] sm:$0xff]  ;;  %p270_p0 = pnand %p269_p13, %p263_p10 }
  0x26   :  { %210 = vmatpush3.xpose.msk.msra.mxu0 %vm47_vm0, %v55_v4 }
  0x27   :  { %211 = vmatprep.subr.msk.mxu0 %vm47_vm0, %v54_v5 }
  0x2a   :  { %212 = vmatpush3.xpose.msk.msra.mxu0 %vm47_vm0, %v54_v5 }
  0x2d   :  { %214 = vmatmul.mubr.msk.f32.vlgmr.msra.gmra.mxu0 %vm47_vm0, %v53_v6 }
  0xed   :  { %v215_v8 = vpop.f32.mrf.mxu0 }
  0xee   :  { %v153_v10 = vadd.f32 %v215_v8, %v51_v7 }
  0xef   :  { %v143_v11 = vpop.f32.mrf.mxu0 }
  0xf0   :  { %155 = vst.msk [vmem:[#allocation2 + $0x8] sm:$0xff] %vm47_vm0, %v153_v10  ;;  %v152_v12 = vadd.f32 %v143_v11, %v50_v9 }
  0xf2   :  { %154 = vst.msk [vmem:[#allocation2] sm:$0xff] %vm47_vm0, %v152_v12 }
  0xf7   :  { %v160_v14 = vld [vmem:[#allocation2 + $0x8] sm:$0xff] }
  0xf8   :  { %v169_v15 = vadd.f32 %v198_v13, %v160_v14 }
  0xf9   :  { %v159_v16 = vld [vmem:[#allocation2] sm:$0xff] }
  0xfa   :  { %v168_v17 = vadd.f32 %v198_v13, %v159_v16  ;;  %v171_v18 = vmax.f32 %v169_v15, 0.0 }
  0xfc   :  { %v170_v19 = vmax.f32 %v168_v17, 0.0  ;;  %173 = vst.msk [vmem:[#allocation8 + $0x8] sm:$0xff] %vm47_vm0, %v171_v18 }
  0xfe   :  { %172 = vst.msk [vmem:[#allocation8] sm:$0xff] %vm47_vm0, %v170_v19 }
  0xff   :  { %273 = shalt.err (!%p270_p0)
}
 0x100   :  { %185 = dma.vmem_to_hbm [thread:$0]  %s180_s25, 256, %s354_s3, [#allocation5], %s289_s15, %s289_s15, %s290_s16  }
 0x101   :  { %286 = dma.done.wait [#allocation5], 256  }
 0x102   :  { %287 = vsyncadd [#allocation5], 4294967040 }
 0x103   :  { %189 = vsyncpa [#allocation4], 1 }
 0x104   :  { %190 = vsyncpa [#allocation7], 1 }
 0x105   :  { %191 = vsyncpa [#allocation5], 1 }

</bundles_post_ra>
